<compile_context>
chip_gen: v6e
topology: v6e:2x2x1
jax: 0.10.0
libtpu: 0.0.40
codegen_flags: <defaults>
</compile_context>

<pallas_src>
import functools

import jax
import jax.numpy as jnp
from jax.experimental import pallas as pl
from jax.experimental.pallas import tpu as pltpu


# ----------------------------- Pallas kernel ------------------------------- #

def _fused_graphsage_kernel(num_layers, *refs):
    """Fully fused GraphSAGE forward.

    refs layout:
      x_ref      (N, Fp)   f32   node features (lane-padded)
      src_ref    (E, N)    bf16  one-hot of edge source  (gather x_j = src @ x)
      tgt_ref    (N, E)    bf16  one-hot of edge target  (UNSCALED sum-scatter)
      invdeg_ref (N, 1)    f32   1 / max(in-degree, 1)
      ea_ref     (E, EFp)  bf16  raw edge attributes (lane-padded)
      emb_ref    (EFp, Fp) bf16  edge-attr embedding matrix
      per layer: w_ref (2*Fp, Fp) bf16  [W_l ; W_r] stacked along K
                 b_ref (1, Fp)    f32   bias of lin_l
      out_ref    (N, Fp)   f32
    """
    x_ref, src_ref, tgt_ref, invdeg_ref, ea_ref, emb_ref = refs[:6]
    layer_refs = refs[6:6 + 2 * num_layers]
    out_ref = refs[-1]

    f32 = jnp.float32
    bf16 = jnp.bfloat16

    # edge_attr = torch.mm(edge_attr, emb_ea), fused in-kernel (MXU, f32 acc).
    edge_attr = jnp.dot(ea_ref[...], emb_ref[...], preferred_element_type=f32)

    src_oh = src_ref[...]          # (E, N)  bf16 one-hot (exact)
    tgt_oh = tgt_ref[...]          # (N, E)  bf16 one-hot (exact, unscaled)
    inv_deg = invdeg_ref[...]      # (N, 1)  f32

    x = x_ref[...]                 # VMEM-resident across all layers
    for li in range(num_layers):
        w_ref = layer_refs[2 * li]
        b_ref = layer_refs[2 * li + 1]

        # gather: x_j[e] = x[src[e]]   (one-hot matmul, bf16 MXU, f32 acc)
        x_j = jnp.dot(src_oh, x.astype(bf16), preferred_element_type=f32)  # (E, Fp)
        msg = jnp.maximum(x_j + edge_attr, 0.0)                            # relu(x_j + e)

        # mean aggregation: bf16 sum-scatter on the MXU, exact f32 1/deg scale after.
        agg = jnp.dot(tgt_oh, msg.astype(bf16), preferred_element_type=f32)  # (N, Fp)
        agg = agg * inv_deg

        # fused root + neighbour projection: [agg | x] @ [W_l ; W_r] + b  (one MXU pass)
        cat = jnp.concatenate([agg, x], axis=-1).astype(bf16)               # (N, 2*Fp)
        out = jnp.dot(cat, w_ref[...], preferred_element_type=f32) + b_ref[...]

        if li < num_layers - 1:
            out = jnp.maximum(out, 0.0)   # relu; dropout == identity in eval mode
        x = out

    out_ref[...] = x


# ----------------------------- host wrapper -------------------------------- #

def _round_up(n, m):
    return ((n + m - 1) // m) * m


def _pad2(a, rows, cols):
    return jnp.pad(a, ((0, rows - a.shape[0]), (0, cols - a.shape[1])))


def graphsage_forward(x, src, tgt, edge_attr_raw, emb_ea, params, *, lane=128):
    """params: list of (w_l, b_l, w_r) per SAGEConv layer."""
    N, in_ch = x.shape
    E, ef = edge_attr_raw.shape
    hid_ch = params[0][0].shape[1]
    out_ch = params[-1][0].shape[1]
    num_layers = len(params)

    f32, bf16 = jnp.float32, jnp.bfloat16

    # Lane-pad every feature dim to a multiple of 128 (full MXU K/N tiles,
    # unmasked output stores). Zero padding is exact for all ops used.
    Fp = _round_up(max(in_ch, hid_ch, out_ch, lane), lane)
    EFp = _round_up(max(ef, lane), lane)

    x_p = _pad2(x.astype(f32), N, Fp)
    ea_p = _pad2(edge_attr_raw, E, EFp).astype(bf16)
    emb_p = _pad2(emb_ea, EFp, Fp).astype(bf16)

    # Dense incidence matrices (exact in bf16: entries are 0/1).
    src_oh = jax.nn.one_hot(src, N, dtype=bf16)                 # (E, N)
    tgt_oh = jnp.transpose(jax.nn.one_hot(tgt, N, dtype=bf16))  # (N, E)
    deg = jax.ops.segment_sum(jnp.ones((E,), f32), tgt, num_segments=N)
    inv_deg = (1.0 / jnp.maximum(deg, 1.0)).reshape(N, 1).astype(f32)

    # Per layer: stack [W_l ; W_r] along K (2*Fp) so root + neighbour projection
    # is one MXU pass; bias padded to (1, Fp).
    weight_inputs = []
    for (w_l, b_l, w_r) in params:
        fi, fo = w_l.shape
        w_cat = jnp.zeros((2 * Fp, Fp), f32)
        w_cat = w_cat.at[:fi, :fo].set(w_l)
        w_cat = w_cat.at[Fp:Fp + fi, :fo].set(w_r)
        b_p = jnp.zeros((1, Fp), f32).at[0, :fo].set(b_l)
        weight_inputs += [w_cat.astype(bf16), b_p]

    inputs = [x_p, src_oh, tgt_oh, inv_deg, ea_p, emb_p] + weight_inputs

    def full_spec(arr):
        return pl.BlockSpec(arr.shape, lambda i: (0,) * arr.ndim)

    kernel = functools.partial(_fused_graphsage_kernel, num_layers)
    out_p = pl.pallas_call(
        kernel,
        out_shape=jax.ShapeDtypeStruct((N, Fp), f32),
        grid=(1,),
        in_specs=[full_spec(a) for a in inputs],
        out_specs=pl.BlockSpec((N, Fp), lambda i: (0, 0)),
        compiler_params=pltpu.CompilerParams(
            dimension_semantics=("arbitrary",),
        ),
    )(*inputs)

    return out_p[:, :out_ch]


# --------------------------- pure-JAX reference ----------------------------- #

def graphsage_reference(x, src, tgt, edge_attr_raw, emb_ea, params):
    hp = jax.lax.Precision.HIGHEST
    edge_attr = jnp.dot(edge_attr_raw, emb_ea, precision=hp)
    N = x.shape[0]
    deg = jax.ops.segment_sum(jnp.ones_like(src, dtype=jnp.float32), tgt, N)
    inv_deg = 1.0 / jnp.maximum(deg, 1.0)
    n_layers = len(params)
    for li, (w_l, b_l, w_r) in enumerate(params):
        x_j = x[src]
        msg = jnp.maximum(x_j + edge_attr, 0.0)
        agg = jax.ops.segment_sum(msg, tgt, N) * inv_deg[:, None]
        out = (jnp.dot(agg, w_l, precision=hp) + b_l[None, :]
               + jnp.dot(x, w_r, precision=hp))
        if li < n_layers - 1:
            out = jnp.maximum(out, 0.0)
        x = out
    return x


# --------------------------------- main ------------------------------------ #

if __name__ == "__main__":
    key = jax.random.PRNGKey(0)

    # Small shapes. SAGEConv's message requires x.shape[-1] == edge_attr.shape[-1]
    # for every layer, which forces in_channels == hidden_channels.
    N = 16            # nodes
    E = 48            # edges
    IN = 32           # in_channels == hidden_channels
    HID = 32
    OUT = 16          # out_channels
    EF = 8            # raw edge-feature dim
    NUM_LAYERS = 3

    keys = jax.random.split(key, 16)
    x = jax.random.normal(keys[0], (N, IN), dtype=jnp.float32)
    edge_attr_raw = jax.random.normal(keys[1], (E, EF), dtype=jnp.float32)
    emb_ea = jax.random.normal(keys[2], (EF, IN), dtype=jnp.float32) * 0.1

    src = jax.random.randint(keys[3], (E,), 0, N)
    tgt = jax.random.randint(keys[4], (E,), 0, N)

    # Deterministic parameter init (SAGEConv: lin_l has bias, lin_r has none).
    dims = [(IN, HID)] + [(HID, HID)] * (NUM_LAYERS - 2) + [(HID, OUT)]
    params = []
    for li, (fi, fo) in enumerate(dims):
        k1, k2, k3 = jax.random.split(keys[5 + li], 3)
        scale = 1.0 / jnp.sqrt(fi)
        w_l = jax.random.uniform(k1, (fi, fo), jnp.float32, -scale, scale)
        b_l = jax.random.uniform(k2, (fo,), jnp.float32, -scale, scale)
        w_r = jax.random.uniform(k3, (fi, fo), jnp.float32, -scale, scale)
        params.append((w_l, b_l, w_r))

    out = graphsage_forward(x, src, tgt, edge_attr_raw, emb_ea, params)
    out = jax.block_until_ready(out)
    assert out.shape == (N, OUT), out.shape

    # Numerical check against an f32 pure-JAX reference (bf16 MXU => loose tol).
    ref = graphsage_reference(x, src, tgt, edge_attr_raw, emb_ea, params)
    rel_err = jnp.linalg.norm(out - ref) / jnp.maximum(jnp.linalg.norm(ref), 1e-6)
    assert bool(rel_err < 0.1), f"relative L2 error too large: {rel_err}"

    print("KERNEL_OK")
</pallas_src>

<mosaic_0001>
module attributes {stable_mosaic.version = 11 : i64} {
  func.func @_fused_graphsage_kernel(%arg0: i32, %arg1: memref<16x128xf32, #tpu.memory_space<vmem>>, %arg2: memref<48x16xbf16, #tpu.memory_space<vmem>>, %arg3: memref<16x48xbf16, #tpu.memory_space<vmem>>, %arg4: memref<16x1xf32, #tpu.memory_space<vmem>>, %arg5: memref<48x128xbf16, #tpu.memory_space<vmem>>, %arg6: memref<128x128xbf16, #tpu.memory_space<vmem>>, %arg7: memref<256x128xbf16, #tpu.memory_space<vmem>>, %arg8: memref<1x128xf32, #tpu.memory_space<vmem>>, %arg9: memref<256x128xbf16, #tpu.memory_space<vmem>>, %arg10: memref<1x128xf32, #tpu.memory_space<vmem>>, %arg11: memref<256x128xbf16, #tpu.memory_space<vmem>>, %arg12: memref<1x128xf32, #tpu.memory_space<vmem>>, %arg13: memref<16x128xf32, #tpu.memory_space<vmem>>) attributes {dimension_semantics = [#tpu.dimension_semantics<arbitrary>], iteration_bounds = array<i64: 1>, scalar_prefetch = 0 : i64, scratch_operands = 0 : i64, tpu.core_type = #tpu.core_type<tc>, window_params = [{pipeline_mode = #tpu.pipeline_mode<synchronous>, transform_indices = @transform_0, window_bounds = array<i64: 16, 128>}, {pipeline_mode = #tpu.pipeline_mode<synchronous>, transform_indices = @transform_1, window_bounds = array<i64: 48, 16>}, {pipeline_mode = #tpu.pipeline_mode<synchronous>, transform_indices = @transform_2, window_bounds = array<i64: 16, 48>}, {pipeline_mode = #tpu.pipeline_mode<synchronous>, transform_indices = @transform_3, window_bounds = array<i64: 16, 1>}, {pipeline_mode = #tpu.pipeline_mode<synchronous>, transform_indices = @transform_4, window_bounds = array<i64: 48, 128>}, {pipeline_mode = #tpu.pipeline_mode<synchronous>, transform_indices = @transform_5, window_bounds = array<i64: 128, 128>}, {pipeline_mode = #tpu.pipeline_mode<synchronous>, transform_indices = @transform_6, window_bounds = array<i64: 256, 128>}, {pipeline_mode = #tpu.pipeline_mode<synchronous>, transform_indices = @transform_7, window_bounds = array<i64: 1, 128>}, {pipeline_mode = #tpu.pipeline_mode<synchronous>, transform_indices = @transform_8, window_bounds = array<i64: 256, 128>}, {pipeline_mode = #tpu.pipeline_mode<synchronous>, transform_indices = @transform_9, window_bounds = array<i64: 1, 128>}, {pipeline_mode = #tpu.pipeline_mode<synchronous>, transform_indices = @transform_10, window_bounds = array<i64: 256, 128>}, {pipeline_mode = #tpu.pipeline_mode<synchronous>, transform_indices = @transform_11, window_bounds = array<i64: 1, 128>}, {pipeline_mode = #tpu.pipeline_mode<synchronous>, transform_indices = @transform_12, window_bounds = array<i64: 16, 128>}]} {
    %c0 = arith.constant 0 : index
    %c0_0 = arith.constant 0 : index
    %0 = vector.load %arg5[%c0, %c0_0] : memref<48x128xbf16, #tpu.memory_space<vmem>>, vector<48x128xbf16>
    %c0_1 = arith.constant 0 : index
    %c0_2 = arith.constant 0 : index
    %1 = vector.load %arg6[%c0_1, %c0_2] : memref<128x128xbf16, #tpu.memory_space<vmem>>, vector<128x128xbf16>
    %cst = arith.constant dense<0.000000e+00> : vector<48x128xf32>
    %2 = tpu.matmul %0, %1, %cst {dimension_numbers = #tpu.dot_dimension_numbers<[1], [0], [0], [1], [0, 0, 1, 1], [], []>} : vector<48x128xbf16>, vector<128x128xbf16>, vector<48x128xf32> -> vector<48x128xf32>
    %c0_3 = arith.constant 0 : index
    %c0_4 = arith.constant 0 : index
    %3 = vector.load %arg2[%c0_3, %c0_4] : memref<48x16xbf16, #tpu.memory_space<vmem>>, vector<48x16xbf16>
    %c0_5 = arith.constant 0 : index
    %c0_6 = arith.constant 0 : index
    %4 = vector.load %arg3[%c0_5, %c0_6] : memref<16x48xbf16, #tpu.memory_space<vmem>>, vector<16x48xbf16>
    %c0_7 = arith.constant 0 : index
    %c0_8 = arith.constant 0 : index
    %5 = vector.load %arg4[%c0_7, %c0_8] : memref<16x1xf32, #tpu.memory_space<vmem>>, vector<16x1xf32>
    %c0_9 = arith.constant 0 : index
    %c0_10 = arith.constant 0 : index
    %6 = vector.load %arg1[%c0_9, %c0_10] : memref<16x128xf32, #tpu.memory_space<vmem>>, vector<16x128xf32>
    %7 = arith.truncf %6 : vector<16x128xf32> to vector<16x128xbf16>
    %cst_11 = arith.constant dense<0.000000e+00> : vector<48x128xf32>
    %8 = tpu.matmul %3, %7, %cst_11 {dimension_numbers = #tpu.dot_dimension_numbers<[1], [0], [0], [1], [0, 0, 1, 1], [], []>} : vector<48x16xbf16>, vector<16x128xbf16>, vector<48x128xf32> -> vector<48x128xf32>
    %9 = arith.addf %8, %2 : vector<48x128xf32>
    %cst_12 = arith.constant 0.000000e+00 : f32
    %10 = vector.broadcast %cst_12 : f32 to vector<48x128xf32>
    %11 = arith.maximumf %9, %10 : vector<48x128xf32>
    %12 = arith.truncf %11 : vector<48x128xf32> to vector<48x128xbf16>
    %cst_13 = arith.constant dense<0.000000e+00> : vector<16x128xf32>
    %13 = tpu.matmul %4, %12, %cst_13 {dimension_numbers = #tpu.dot_dimension_numbers<[1], [0], [0], [1], [0, 0, 1, 1], [], []>} : vector<16x48xbf16>, vector<48x128xbf16>, vector<16x128xf32> -> vector<16x128xf32>
    %14 = vector.broadcast %5 : vector<16x1xf32> to vector<16x128xf32>
    %15 = arith.mulf %13, %14 : vector<16x128xf32>
    %16 = tpu.concatenate %15, %6 in 1 : vector<16x128xf32>, vector<16x128xf32> -> vector<16x256xf32>
    %17 = arith.truncf %16 : vector<16x256xf32> to vector<16x256xbf16>
    %c0_14 = arith.constant 0 : index
    %c0_15 = arith.constant 0 : index
    %18 = vector.load %arg7[%c0_14, %c0_15] : memref<256x128xbf16, #tpu.memory_space<vmem>>, vector<256x128xbf16>
    %cst_16 = arith.constant dense<0.000000e+00> : vector<16x128xf32>
    %19 = tpu.matmul %17, %18, %cst_16 {dimension_numbers = #tpu.dot_dimension_numbers<[1], [0], [0], [1], [0, 0, 1, 1], [], []>} : vector<16x256xbf16>, vector<256x128xbf16>, vector<16x128xf32> -> vector<16x128xf32>
    %c0_17 = arith.constant 0 : index
    %c0_18 = arith.constant 0 : index
    %20 = vector.load %arg8[%c0_17, %c0_18] : memref<1x128xf32, #tpu.memory_space<vmem>>, vector<1x128xf32>
    %21 = vector.broadcast %20 : vector<1x128xf32> to vector<16x128xf32>
    %22 = arith.addf %19, %21 : vector<16x128xf32>
    %cst_19 = arith.constant 0.000000e+00 : f32
    %23 = vector.broadcast %cst_19 : f32 to vector<16x128xf32>
    %24 = arith.maximumf %22, %23 : vector<16x128xf32>
    %25 = arith.truncf %24 : vector<16x128xf32> to vector<16x128xbf16>
    %cst_20 = arith.constant dense<0.000000e+00> : vector<48x128xf32>
    %26 = tpu.matmul %3, %25, %cst_20 {dimension_numbers = #tpu.dot_dimension_numbers<[1], [0], [0], [1], [0, 0, 1, 1], [], []>} : vector<48x16xbf16>, vector<16x128xbf16>, vector<48x128xf32> -> vector<48x128xf32>
    %27 = arith.addf %26, %2 : vector<48x128xf32>
    %cst_21 = arith.constant 0.000000e+00 : f32
    %28 = vector.broadcast %cst_21 : f32 to vector<48x128xf32>
    %29 = arith.maximumf %27, %28 : vector<48x128xf32>
    %30 = arith.truncf %29 : vector<48x128xf32> to vector<48x128xbf16>
    %cst_22 = arith.constant dense<0.000000e+00> : vector<16x128xf32>
    %31 = tpu.matmul %4, %30, %cst_22 {dimension_numbers = #tpu.dot_dimension_numbers<[1], [0], [0], [1], [0, 0, 1, 1], [], []>} : vector<16x48xbf16>, vector<48x128xbf16>, vector<16x128xf32> -> vector<16x128xf32>
    %32 = vector.broadcast %5 : vector<16x1xf32> to vector<16x128xf32>
    %33 = arith.mulf %31, %32 : vector<16x128xf32>
    %34 = tpu.concatenate %33, %24 in 1 : vector<16x128xf32>, vector<16x128xf32> -> vector<16x256xf32>
    %35 = arith.truncf %34 : vector<16x256xf32> to vector<16x256xbf16>
    %c0_23 = arith.constant 0 : index
    %c0_24 = arith.constant 0 : index
    %36 = vector.load %arg9[%c0_23, %c0_24] : memref<256x128xbf16, #tpu.memory_space<vmem>>, vector<256x128xbf16>
    %cst_25 = arith.constant dense<0.000000e+00> : vector<16x128xf32>
    %37 = tpu.matmul %35, %36, %cst_25 {dimension_numbers = #tpu.dot_dimension_numbers<[1], [0], [0], [1], [0, 0, 1, 1], [], []>} : vector<16x256xbf16>, vector<256x128xbf16>, vector<16x128xf32> -> vector<16x128xf32>
    %c0_26 = arith.constant 0 : index
    %c0_27 = arith.constant 0 : index
    %38 = vector.load %arg10[%c0_26, %c0_27] : memref<1x128xf32, #tpu.memory_space<vmem>>, vector<1x128xf32>
    %39 = vector.broadcast %38 : vector<1x128xf32> to vector<16x128xf32>
    %40 = arith.addf %37, %39 : vector<16x128xf32>
    %cst_28 = arith.constant 0.000000e+00 : f32
    %41 = vector.broadcast %cst_28 : f32 to vector<16x128xf32>
    %42 = arith.maximumf %40, %41 : vector<16x128xf32>
    %43 = arith.truncf %42 : vector<16x128xf32> to vector<16x128xbf16>
    %cst_29 = arith.constant dense<0.000000e+00> : vector<48x128xf32>
    %44 = tpu.matmul %3, %43, %cst_29 {dimension_numbers = #tpu.dot_dimension_numbers<[1], [0], [0], [1], [0, 0, 1, 1], [], []>} : vector<48x16xbf16>, vector<16x128xbf16>, vector<48x128xf32> -> vector<48x128xf32>
    %45 = arith.addf %44, %2 : vector<48x128xf32>
    %cst_30 = arith.constant 0.000000e+00 : f32
    %46 = vector.broadcast %cst_30 : f32 to vector<48x128xf32>
    %47 = arith.maximumf %45, %46 : vector<48x128xf32>
    %48 = arith.truncf %47 : vector<48x128xf32> to vector<48x128xbf16>
    %cst_31 = arith.constant dense<0.000000e+00> : vector<16x128xf32>
    %49 = tpu.matmul %4, %48, %cst_31 {dimension_numbers = #tpu.dot_dimension_numbers<[1], [0], [0], [1], [0, 0, 1, 1], [], []>} : vector<16x48xbf16>, vector<48x128xbf16>, vector<16x128xf32> -> vector<16x128xf32>
    %50 = vector.broadcast %5 : vector<16x1xf32> to vector<16x128xf32>
    %51 = arith.mulf %49, %50 : vector<16x128xf32>
    %52 = tpu.concatenate %51, %42 in 1 : vector<16x128xf32>, vector<16x128xf32> -> vector<16x256xf32>
    %53 = arith.truncf %52 : vector<16x256xf32> to vector<16x256xbf16>
    %c0_32 = arith.constant 0 : index
    %c0_33 = arith.constant 0 : index
    %54 = vector.load %arg11[%c0_32, %c0_33] : memref<256x128xbf16, #tpu.memory_space<vmem>>, vector<256x128xbf16>
    %cst_34 = arith.constant dense<0.000000e+00> : vector<16x128xf32>
    %55 = tpu.matmul %53, %54, %cst_34 {dimension_numbers = #tpu.dot_dimension_numbers<[1], [0], [0], [1], [0, 0, 1, 1], [], []>} : vector<16x256xbf16>, vector<256x128xbf16>, vector<16x128xf32> -> vector<16x128xf32>
    %c0_35 = arith.constant 0 : index
    %c0_36 = arith.constant 0 : index
    %56 = vector.load %arg12[%c0_35, %c0_36] : memref<1x128xf32, #tpu.memory_space<vmem>>, vector<1x128xf32>
    %57 = vector.broadcast %56 : vector<1x128xf32> to vector<16x128xf32>
    %58 = arith.addf %55, %57 : vector<16x128xf32>
    %c0_37 = arith.constant 0 : index
    %c0_38 = arith.constant 0 : index
    %59 = vector.load %arg13[%c0_37, %c0_38] : memref<16x128xf32, #tpu.memory_space<vmem>>, vector<16x128xf32>
    tpu.vector_store %arg13[%c0_37, %c0_38], %58 {strides = array<i32>} : memref<16x128xf32, #tpu.memory_space<vmem>>, vector<16x128xf32>,
    return
  }
  func.func @transform_0(%arg0: i32) -> (i32, i32) {
    %c0_i32 = arith.constant 0 : i32
    %c0_i32_0 = arith.constant 0 : i32
    %c0_i32_1 = arith.constant 0 : i32
    return %c0_i32, %c0_i32_0 : i32, i32
  }
  func.func @transform_1(%arg0: i32) -> (i32, i32) {
    %c0_i32 = arith.constant 0 : i32
    %c0_i32_0 = arith.constant 0 : i32
    %c0_i32_1 = arith.constant 0 : i32
    return %c0_i32, %c0_i32_0 : i32, i32
  }
  func.func @transform_2(%arg0: i32) -> (i32, i32) {
    %c0_i32 = arith.constant 0 : i32
    %c0_i32_0 = arith.constant 0 : i32
    %c0_i32_1 = arith.constant 0 : i32
    return %c0_i32, %c0_i32_0 : i32, i32
  }
  func.func @transform_3(%arg0: i32) -> (i32, i32) {
    %c0_i32 = arith.constant 0 : i32
    %c0_i32_0 = arith.constant 0 : i32
    %c0_i32_1 = arith.constant 0 : i32
    return %c0_i32, %c0_i32_0 : i32, i32
  }
  func.func @transform_4(%arg0: i32) -> (i32, i32) {
    %c0_i32 = arith.constant 0 : i32
    %c0_i32_0 = arith.constant 0 : i32
    %c0_i32_1 = arith.constant 0 : i32
    return %c0_i32, %c0_i32_0 : i32, i32
  }
  func.func @transform_5(%arg0: i32) -> (i32, i32) {
    %c0_i32 = arith.constant 0 : i32
    %c0_i32_0 = arith.constant 0 : i32
    %c0_i32_1 = arith.constant 0 : i32
    return %c0_i32, %c0_i32_0 : i32, i32
  }
  func.func @transform_6(%arg0: i32) -> (i32, i32) {
    %c0_i32 = arith.constant 0 : i32
    %c0_i32_0 = arith.constant 0 : i32
    %c0_i32_1 = arith.constant 0 : i32
    return %c0_i32, %c0_i32_0 : i32, i32
  }
  func.func @transform_7(%arg0: i32) -> (i32, i32) {
    %c0_i32 = arith.constant 0 : i32
    %c0_i32_0 = arith.constant 0 : i32
    %c0_i32_1 = arith.constant 0 : i32
    return %c0_i32, %c0_i32_0 : i32, i32
  }
  func.func @transform_8(%arg0: i32) -> (i32, i32) {
    %c0_i32 = arith.constant 0 : i32
    %c0_i32_0 = arith.constant 0 : i32
    %c0_i32_1 = arith.constant 0 : i32
    return %c0_i32, %c0_i32_0 : i32, i32
  }
  func.func @transform_9(%arg0: i32) -> (i32, i32) {
    %c0_i32 = arith.constant 0 : i32
    %c0_i32_0 = arith.constant 0 : i32
    %c0_i32_1 = arith.constant 0 : i32
    return %c0_i32, %c0_i32_0 : i32, i32
  }
  func.func @transform_10(%arg0: i32) -> (i32, i32) {
    %c0_i32 = arith.constant 0 : i32
    %c0_i32_0 = arith.constant 0 : i32
    %c0_i32_1 = arith.constant 0 : i32
    return %c0_i32, %c0_i32_0 : i32, i32
  }
  func.func @transform_11(%arg0: i32) -> (i32, i32) {
    %c0_i32 = arith.constant 0 : i32
    %c0_i32_0 = arith.constant 0 : i32
    %c0_i32_1 = arith.constant 0 : i32
    return %c0_i32, %c0_i32_0 : i32, i32
  }
  func.func @transform_12(%arg0: i32) -> (i32, i32) {
    %c0_i32 = arith.constant 0 : i32
    %c0_i32_0 = arith.constant 0 : i32
    %c0_i32_1 = arith.constant 0 : i32
    return %c0_i32, %c0_i32_0 : i32, i32
  }
}

</mosaic_0001>

<bundles_post_ra>
// kernel: tpu_custom_call.1
= control target key start
LH: loop header
LB: loop body
LE: loop exit
PB: predicated region body
PF: predicated region fallthrough
CT: control target
= control target key end

     0   :  { %17 = vsyncpa [#allocation3], 0  ;;  %s1962_s0 = inlined_call_operand.vmem [shape: f32[16,128], index: 0, kind: input, shape index: {}]   ;;  %s1963_s1 = inlined_call_operand.vmem [shape: bf16[48,16], index: 1, kind: input, shape index: {}]   ;;  %s1964_s2 = inlined_call_operand.hbm [shape: bf16[16,48], index: 2, kind: input, shape index: {}]   ;;  %s1965_s3 = inlined_call_operand.vmem [shape: f32[16,1], index: 3, kind: input, shape index: {}]   ;;  %s1966_s4 = inlined_call_operand.vmem [shape: bf16[48,128], index: 4, kind: input, shape index: {}]   ;;  %s1967_s5 = inlined_call_operand.hbm [shape: bf16[128,128], index: 5, kind: input, shape index: {}]   ;;  %s1968_s6 = inlined_call_operand.hbm [shape: bf16[256,128], index: 6, kind: input, shape index: {}]   ;;  %s1969_s7 = inlined_call_operand.vmem [shape: f32[1,128], index: 7, kind: input, shape index: {}]   ;;  %s1970_s8 = inlined_call_operand.hbm [shape: bf16[256,128], index: 8, kind: input, shape index: {}]   ;;  %s1971_s9 = inlined_call_operand.vmem [shape: f32[1,128], index: 9, kind: input, shape index: {}]   ;;  %s1972_s10 = inlined_call_operand.hbm [shape: bf16[256,128], index: 10, kind: input, shape index: {}]   ;;  %s1973_s11 = inlined_call_operand.vmem [shape: f32[1,128], index: 11, kind: input, shape index: {}]   ;;  %s1974_s12 = inlined_call_operand.hbm [shape: f32[16,128], index: 12, kind: output, shape index: {}]  }
   0x1   :  { %18 = vsyncpa [#allocation6], 0 }
   0x2   :  { %19 = vsyncpa [#allocation9], 0 }
   0x3   :  { %20 = vsyncpa [#allocation4], 0  ;;  %s1684_s21 = smov [#allocation5]   ;;  %s1685_s23 = smov [#allocation8]  }
   0x4   :  { %s46_s22 = sshll.u32 %s1684_s21, 4  ;;  %s72_s24 = sshll.u32 %s1685_s23, 4  ;;  %s47_s22 = int_to_ptr.vmem [resolvable:$true] %s46_s22  ;;  %s73_s24 = int_to_ptr.vmem [resolvable:$true] %s72_s24 }
   0x5   :  { %s1564_s25 = scalar_lea.vmem %s47_s22, 1024  ;;  %p1569_p1 = scmp.lt.s32.totalorder %s47_s22, %s47_s22 }
   0x6   :  { %p1565_p0 = scmp.ne.s32.totalorder %s47_s22, %s1564_s25  ;;  %p1570_p2 = scmp.lt.s32.totalorder %s1564_s25, %s1564_s25 }
   0x8   :  { %p1571_p3 = por %p1570_p2, %p1569_p1 }
   0xa   :  { %p1572_p4 = pnand %p1571_p3, %p1565_p0 }
   0xc   :  { %1575 = shalt.err (!%p1572_p4)
}
   0xd   :  { %s1686_s26 = smov 64   ;;  %s1687_s27 = smov 4  }
   0xe   :  { %52 = dma.hbm_to_vmem [thread:$0]  %s1967_s5, 1024, %s47_s22, [#allocation6], %s1686_s26, %s1686_s26, %s1687_s27  }
   0xf   :  { %s1584_s30 = scalar_lea.vmem %s73_s24, 2048  ;;  %p1589_p6 = scmp.lt.s32.totalorder %s73_s24, %s73_s24 }
  0x10   :  { %p1585_p5 = scmp.ne.s32.totalorder %s73_s24, %s1584_s30  ;;  %p1590_p7 = scmp.lt.s32.totalorder %s1584_s30, %s1584_s30 }
  0x12   :  { %p1591_p8 = por %p1590_p7, %p1589_p6 }
  0x14   :  { %p1592_p9 = pnand %p1591_p8, %p1585_p5 }
  0x16   :  { %1595 = shalt.err (!%p1592_p9)
}
  0x17   :  { %78 = dma.hbm_to_vmem [thread:$0]  %s1970_s8, 2048, %s73_s24, [#allocation9], %s1686_s26, %s1686_s26, %s1687_s27  }
  0x18   :  { %s1688_s15 = smov [#allocation2]   ;;  %s1689_s17 = smov [#allocation7]  }
  0x19   :  { %s30_s16 = sshll.u32 %s1688_s15, 4  ;;  %s58_s18 = sshll.u32 %s1689_s17, 4  ;;  %s31_s16 = int_to_ptr.vmem [resolvable:$true] %s30_s16  ;;  %s59_s18 = int_to_ptr.vmem [resolvable:$true] %s58_s18 }
  0x1a   :  { %s1604_s5 = scalar_lea.vmem %s31_s16, 128  ;;  %p1609_p11 = scmp.lt.s32.totalorder %s31_s16, %s31_s16 }
  0x1b   :  { %p1605_p10 = scmp.ne.s32.totalorder %s31_s16, %s1604_s5  ;;  %p1610_p12 = scmp.lt.s32.totalorder %s1604_s5, %s1604_s5 }
  0x1d   :  { %p1611_p13 = por %p1610_p12, %p1609_p11 }
  0x1f   :  { %p1612_p0 = pnand %p1611_p13, %p1605_p10 }
  0x21   :  { %1615 = shalt.err (!%p1612_p0)
}
  0x22   :  { %36 = dma.hbm_to_vmem [thread:$0]  %s1964_s2, 128, %s31_s16, [#allocation3], %s1686_s26, %s1686_s26, %s1687_s27  }
  0x23   :  { %s1624_s8 = scalar_lea.vmem %s59_s18, 2048  ;;  %p1629_p2 = scmp.lt.s32.totalorder %s59_s18, %s59_s18 }
  0x24   :  { %p1625_p1 = scmp.ne.s32.totalorder %s59_s18, %s1624_s8  ;;  %p1630_p3 = scmp.lt.s32.totalorder %s1624_s8, %s1624_s8 }
  0x26   :  { %p1631_p4 = por %p1630_p3, %p1629_p2 }
  0x28   :  { %p1632_p5 = pnand %p1631_p4, %p1625_p1 }
  0x2a   :  { %1635 = shalt.err (!%p1632_p5)
}
  0x2b   :  { %64 = dma.hbm_to_vmem [thread:$0]  %s1968_s6, 2048, %s59_s18, [#allocation6], %s1686_s26, %s1686_s26, %s1687_s27  }
  0x2c   :  { %s1690_s23 = smov [#allocation10]  }
  0x2d   :  { %s86_s24 = sshll.u32 %s1690_s23, 4  ;;  %s87_s24 = int_to_ptr.vmem [resolvable:$true] %s86_s24 }
  0x2e   :  { %s1644_s25 = scalar_lea.vmem %s87_s24, 2048  ;;  %p1649_p7 = scmp.lt.s32.totalorder %s87_s24, %s87_s24 }
  0x2f   :  { %p1645_p6 = scmp.ne.s32.totalorder %s87_s24, %s1644_s25  ;;  %p1650_p8 = scmp.lt.s32.totalorder %s1644_s25, %s1644_s25 }
  0x31   :  { %p1651_p9 = por %p1650_p8, %p1649_p7 }
  0x33   :  { %p1652_p10 = pnand %p1651_p9, %p1645_p6 }
  0x35   :  { %1655 = shalt.err (!%p1652_p10)
}
  0x36   :  { %92 = dma.hbm_to_vmem [thread:$0]  %s1972_s10, 2048, %s87_s24, [#allocation9], %s1686_s26, %s1686_s26, %s1687_s27  }
  0x37   :  { %1676 = dma.done.wait [#allocation3], 128  }
  0x38   :  { %1677 = vsyncadd [#allocation3], 4294967168 }
  0x39   :  { %1678 = dma.done.wait [#allocation6], 3072  }
  0x3a   :  { %1679 = vsyncadd [#allocation6], 4294964224 }
  0x3b   :  { %1680 = dma.done.wait [#allocation9], 4096  }
  0x3c   :  { %1681 = vsyncadd [#allocation9], 4294963200  ;;  %v1691_v0 = vmov 0.0   ;;  %vm1692_vm0 = vmmov 0   ;;  %v1493_v1 = vld [vmem:[#allocation5 + $0x38] sm:$0xff]   ;;  %v1494_v2 = vld [vmem:[#allocation5 + $0x30] sm:$0xff]  }
  0x3d   :  { %1377 = vmatprep.subr.bf16.mxu0 %v1691_v0  ;;  %1477 = vmatprep.subr.bf16.mxu1 %v1691_v0  ;;  %v1495_v3 = vld [vmem:[#allocation5 + $0x28] sm:$0xff]   ;;  %v266_v4 = vld [vmem:[%s1962_s0] sm:$0xff]  ;;  %v267_v5 = vld [vmem:[%s1962_s0 + $0x8] sm:$0xff]  ;;  %vm284_vm1 = vcmask 130048   ;;  %v1693_v19 = vmov 0   ;;  %vm365_vm2 = vcmask 392192  }
  0x3e   :  { %1393 = vmatprep.mubr.msk.bf16.mxu0 %vm1692_vm0, %v1691_v0  ;;  %1411 = vmatprep.mubr.msk.bf16.mxu1 %vm1692_vm0, %v1691_v0  ;;  %v1496_v6 = vld [vmem:[#allocation5 + $0x20] sm:$0xff]   ;;  %v1806_v7 = vpack.c.bf16 %v267_v5, %v266_v4  ;;  %v1497_v9 = vld [vmem:[#allocation5 + $0x18] sm:$0xff]   ;;  %v1498_v10 = vld [vmem:[#allocation5 + $0x10] sm:$0xff]   ;;  %s1694_s25 = smov [#allocation11]  }
  0x3f   :  { %1378 = vmatpush3.bf16.msra.mxu0 %v1493_v1  ;;  %v1811_v8 = vld [vmem:[%s1963_s1 + $0x8] sm:$0xff]   ;;  %v1824_v11 = vld [vmem:[%s1963_s1 + $0x10] sm:$0xff]   ;;  %v1501_v14 = vld [vmem:[%s1966_s4] sm:$0xff]   ;;  %1492 = vset.pattern.permute.xlu0 %v1693_v19  ;;  %s1184_s2 = sshll.u32 %s1694_s25, 4  ;;  %s1185_s2 = int_to_ptr.vmem [resolvable:$true] %s1184_s2 }
  0x40   :  { %1379 = vmatprep.subr.bf16.mxu0 %v1691_v0  ;;  %1478 = vmatpush3.bf16.msra.mxu1 %v1806_v7  ;;  %v1499_v12 = vld [vmem:[#allocation5 + $0x8] sm:$0xff]   ;;  %v1500_v13 = vld [vmem:[#allocation5] sm:$0xff]   ;;  %v1854_v17 = vld [vmem:[%s1963_s1] sm:$0xff]   ;;  %s1656_s28 = scalar_lea.vmem %s1185_s2, 256  ;;  %p1661_p12 = scmp.lt.s32.totalorder %s1185_s2, %s1185_s2 }
  0x41   :  { %1419 = vmatprep.subr.bf16.mxu1 %v1691_v0  ;;  %v1503_v15 = vld [vmem:[%s1966_s4 + $0x8] sm:$0xff]   ;;  %v1505_v16 = vld [vmem:[%s1966_s4 + $0x10] sm:$0xff]   ;;  %v264_v18 = vld [vmem:[%s1965_s3] sm:$0xff]  ;;  %p1657_p11 = scmp.ne.s32.totalorder %s1185_s2, %s1656_s28  ;;  %p1662_p13 = scmp.lt.s32.totalorder %s1656_s28, %s1656_s28 }
  0x42   :  { %412 = vperm.xlu0 %1492, %v264_v18   ;;  %v265_v20 = vld [vmem:[%s1965_s3 + $0x8] sm:$0xff]  ;;  %v1508_v59 = vld [vmem:[#allocation7 + $0x78] sm:$0xff]   ;;  %v1510_v63 = vld [vmem:[#allocation7 + $0x70] sm:$0xff]  }
  0x43   :  { %1380 = vmatpush3.bf16.msra.mxu0 %v1494_v2  ;;  %1412 = vmatmul.mubr.msk.bf16.vlgmr.msra.gmra.mxu1 %vm284_vm1, %v1811_v8  ;;  %v1886_v61 = vld [vmem:[#allocation2] sm:$0xff]   ;;  %v1511_v1 = vld [vmem:[#allocation7 + $0x30] sm:$0xff]   ;;  %v1512_v2 = vld [vmem:[#allocation7 + $0x68] sm:$0xff]   ;;  %p1663_p0 = por %p1662_p13, %p1661_p12 }
  0x44   :  { %1381 = vmatprep.subr.bf16.mxu0 %v1691_v0  ;;  %1415 = vmatprep.mubr.msk.bf16.mxu1 %vm1692_vm0, %v1691_v0  ;;  %v1509_v62 = vld [vmem:[#allocation7 + $0x38] sm:$0xff]   ;;  %v1514_v4 = vld [vmem:[#allocation7 + $0x60] sm:$0xff]  }
  0x45   :  { %v1515_v5 = vld [vmem:[#allocation7 + $0x20] sm:$0xff]   ;;  %p1664_p1 = pnand %p1663_p0, %p1657_p11 }
  0x46   :  { %417 = vperm.xlu0 %1492, %v265_v20  }
  0x47   :  { %1382 = vmatpush3.bf16.msra.mxu0 %v1495_v3  ;;  %v1513_v3 = vld [vmem:[#allocation7 + $0x28] sm:$0xff]  }
  0x48   :  { %1383 = vmatprep.subr.bf16.mxu0 %v1691_v0 }
  0x4b   :  { %1384 = vmatpush3.bf16.msra.mxu0 %v1496_v6  ;;  %1416 = vmatmul.mubr.msk.bf16.gmra.mxu1 %vm284_vm1, %v1824_v11  ;;  %v1516_v6 = vld [vmem:[#allocation7 + $0x58] sm:$0xff]  }
  0x4c   :  { %1385 = vmatprep.subr.bf16.mxu0 %v1691_v0  ;;  %1425 = vmatprep.mubr.msk.bf16.mxu1 %vm1692_vm0, %v1691_v0 }
  0x4f   :  { %1386 = vmatpush3.bf16.msra.mxu0 %v1497_v9  ;;  %v1517_v9 = vld [vmem:[#allocation7 + $0x18] sm:$0xff]  }
  0x50   :  { %1387 = vmatprep.subr.bf16.mxu0 %v1691_v0 }
  0x53   :  { %1388 = vmatpush3.bf16.msra.mxu0 %v1498_v10  ;;  %v1518_v10 = vld [vmem:[#allocation7 + $0x50] sm:$0xff]  }
  0x54   :  { %1389 = vmatprep.subr.bf16.mxu0 %v1691_v0 }
  0x57   :  { %1390 = vmatpush3.bf16.msra.mxu0 %v1499_v12  ;;  %v1519_v12 = vld [vmem:[#allocation7 + $0x10] sm:$0xff]  }
  0x58   :  { %1391 = vmatprep.subr.bf16.mxu0 %v1691_v0 }
  0x5b   :  { %1392 = vmatpush3.bf16.msra.mxu0 %v1500_v13  ;;  %v1520_v13 = vld [vmem:[#allocation7 + $0x48] sm:$0xff]  }
  0x5c   :  { %1405 = vmatprep.subr.bf16.mxu0 %v1691_v0 }
  0x5e   :  { %1394 = vmatmul.mubr.bf16.vlgmr.msra.gmra.mxu0 %v1501_v14  ;;  %v1522_v14 = vld [vmem:[#allocation7 + $0x40] sm:$0xff]  }
  0x5f   :  { %1406 = vmatpush3.bf16.msra.mxu0 %v1806_v7  ;;  %1397 = vmatprep.mubr.msk.bf16.mxu0 %vm1692_vm0, %v1691_v0 }
  0x60   :  { %1429 = vmatprep.subr.bf16.mxu0 %v1691_v0 }
  0x66   :  { %1398 = vmatmul.mubr.bf16.gmra.mxu0 %v1503_v15  ;;  %v1523_v15 = vld [vmem:[#allocation7] sm:$0xff]  }
  0x67   :  { %1401 = vmatprep.mubr.msk.bf16.mxu0 %vm1692_vm0, %v1691_v0 }
  0x6e   :  { %1402 = vmatmul.mubr.bf16.gmra.mxu0 %v1505_v16 }
  0x6f   :  { %1407 = vmatprep.mubr.msk.bf16.mxu0 %vm1692_vm0, %v1691_v0 }
  0x76   :  { %1408 = vmatmul.mubr.msk.bf16.vlgmr.msra.gmra.mxu0 %vm284_vm1, %v1854_v17 }
  0x77   :  { %1431 = vmatprep.mubr.msk.bf16.mxu0 %vm1692_vm0, %v1691_v0 }
  0xbd   :  { %v1892_v16 = vpop.permute.xlu0 %412 }
  0xc1   :  { %v1894_v20 = vpop.permute.xlu0 %417 }
 0x103   :  { %v336_v21 = vpop.f32.mrf.mxu1 }
 0x105   :  { %v1413_v22 = vpop.f32.mrf.mxu1 }
 0x107   :  { %v339_v23 = vpop.f32.mrf.mxu1 }
 0x109   :  { %v1414_v24 = vpop.f32.mrf.mxu1 }
 0x10b   :  { %v344_v25 = vpop.f32.mrf.mxu1 }
 0x10d   :  { %v1417_v26 = vpop.f32.mrf.mxu1 }
 0x10f   :  { %v347_v27 = vpop.f32.mrf.mxu1 }
 0x111   :  { %v1418_v28 = vpop.f32.mrf.mxu1 }
 0x11e   :  { %v1866_v29 = vpop.f32.mrf.mxu0 }
 0x120   :  { %v1395_v30 = vpop.f32.mrf.mxu0 }
 0x121   :  { %v1217_v30 = vld [vmem:[%s1969_s7] ss:$0 sm:$0xff] }
 0x122   :  { %v1868_v31 = vpop.f32.mrf.mxu0 }
 0x124   :  { %v1396_v32 = vpop.f32.mrf.mxu0 }
 0x126   :  { %v1870_v33 = vpop.f32.mrf.mxu0 }
 0x127   :  { %v337_v44 = vadd.f32 %v336_v21, %v1870_v33 }
 0x128   :  { %v1399_v34 = vpop.f32.mrf.mxu0 }
 0x129   :  { %v353_v51 = vmax.f32 %v337_v44, 0.0  ;;  %v1524_v44 = vld [vmem:[#allocation8 + $0x78] sm:$0xff]  }
 0x12a   :  { %v1872_v35 = vpop.f32.mrf.mxu0 }
 0x12b   :  { %v340_v41 = vadd.f32 %v339_v23, %v1872_v35 }
 0x12c   :  { %v1400_v36 = vpop.f32.mrf.mxu0 }
 0x12d   :  { %v354_v48 = vmax.f32 %v340_v41, 0.0 }
 0x12e   :  { %v1874_v37 = vpop.f32.mrf.mxu0 }
 0x12f   :  { %v345_v39 = vadd.f32 %v344_v25, %v1874_v37  ;;  %v358_v54 = vpack.c.bf16 %v354_v48, %v353_v51  ;;  %v1528_v48 = vld [vmem:[#allocation8 + $0x68] sm:$0xff]   ;;  %v1531_v51 = vld [vmem:[#allocation8 + $0x20] sm:$0xff]  }
 0x130   :  { %v1403_v38 = vpop.f32.mrf.mxu0 }
 0x131   :  { %v355_v45 = vmax.f32 %v345_v39, 0.0 }
 0x132   :  { %v1877_v40 = vpop.f32.mrf.mxu0 }
 0x133   :  { %v348_v42 = vadd.f32 %v347_v27, %v1877_v40 }
 0x134   :  { %v1404_v43 = vpop.f32.mrf.mxu0 }
 0x135   :  { %v356_v46 = vmax.f32 %v348_v42, 0.0 }
 0x136   :  { %v328_v47 = vpop.f32.mrf.mxu0 }
 0x137   :  { %v359_v49 = vpack.c.bf16 %v356_v46, %v355_v45  ;;  %v329_v52 = vadd.f32 %v328_v47, %v1866_v29  ;;  %v1525_v45 = vld [vmem:[#allocation8 + $0x38] sm:$0xff]   ;;  %v1526_v46 = vld [vmem:[#allocation8 + $0x70] sm:$0xff]  }
 0x138   :  { %v1409_v50 = vpop.f32.mrf.mxu0  ;;  %v1527_v47 = vld [vmem:[#allocation8 + $0x30] sm:$0xff]  }
 0x139   :  { %1420 = vmatpush3.bf16.msra.mxu1 %v359_v49  ;;  %v351_v57 = vmax.f32 %v329_v52, 0.0  ;;  %v1529_v49 = vld [vmem:[#allocation8 + $0x28] sm:$0xff]   ;;  %v1530_v50 = vld [vmem:[#allocation8 + $0x60] sm:$0xff]   ;;  %v1532_v52 = vld [vmem:[#allocation8 + $0x58] sm:$0xff]  }
 0x13a   :  { %v331_v53 = vpop.f32.mrf.mxu0  ;;  %1421 = vmatprep.subr.bf16.mxu1 %v1691_v0 }
 0x13b   :  { %v332_v55 = vadd.f32 %v331_v53, %v1868_v31  ;;  %v1533_v53 = vld [vmem:[#allocation8 + $0x18] sm:$0xff]  }
 0x13c   :  { %v1410_v56 = vpop.f32.mrf.mxu0 }
 0x13d   :  { %v352_v58 = vmax.f32 %v332_v55, 0.0  ;;  %1422 = vmatpush3.bf16.msra.mxu1 %v358_v54  ;;  %v1534_v54 = vld [vmem:[#allocation8 + $0x50] sm:$0xff]  }
 0x13e   :  { %1423 = vmatprep.subr.bf16.mxu1 %v1691_v0  ;;  %v1535_v55 = vld [vmem:[#allocation8 + $0x10] sm:$0xff]  }
 0x13f   :  { %v357_v60 = vpack.c.bf16 %v352_v58, %v351_v57 }
 0x141   :  { %1424 = vmatpush3.bf16.msra.mxu1 %v357_v60 }
 0x142   :  { %1295 = vmatprep.subr.bf16.mxu1 %v1508_v59 }
 0x144   :  { %1426 = vmatmul.mubr.msk.bf16.vlgmr.msra.gmra.mxu1 %vm365_vm2, %v1886_v61 }
 0x145   :  { %1296 = vmatpush3.bf16.msra.mxu1 %v1509_v62  ;;  %590 = vmatprep.mubr.bf16.mxu1 %v1806_v7  ;;  %v1521_v7 = vld [vmem:[#allocation7 + $0x8] sm:$0xff]  }
 0x146   :  { %1297 = vmatprep.subr.bf16.mxu1 %v1510_v63 }
 0x149   :  { %1298 = vmatpush3.bf16.msra.mxu1 %v1511_v1 }
 0x14a   :  { %1299 = vmatprep.subr.bf16.mxu1 %v1512_v2 }
 0x14d   :  { %1300 = vmatpush3.bf16.msra.mxu1 %v1513_v3 }
 0x14e   :  { %1301 = vmatprep.subr.bf16.mxu1 %v1514_v4 }
 0x151   :  { %1302 = vmatpush3.bf16.msra.mxu1 %v1515_v5 }
 0x152   :  { %1303 = vmatprep.subr.bf16.mxu1 %v1516_v6 }
 0x155   :  { %1304 = vmatpush3.bf16.msra.mxu1 %v1517_v9 }
 0x156   :  { %1305 = vmatprep.subr.bf16.mxu1 %v1518_v10 }
 0x159   :  { %1306 = vmatpush3.bf16.msra.mxu1 %v1519_v12 }
 0x15a   :  { %1307 = vmatprep.subr.bf16.mxu1 %v1520_v13 }
 0x15d   :  { %1308 = vmatpush3.bf16.msra.mxu1 %v1521_v7 }
 0x15e   :  { %1309 = vmatprep.subr.bf16.mxu1 %v1522_v14 }
 0x161   :  { %1310 = vmatpush3.bf16.msra.mxu1 %v1523_v15 }
 0x162   :  { %1443 = vmatprep.subr.bf16.mxu1 %v1691_v0 }
 0x204   :  { %v403_v18 = vpop.f32.mrf.mxu1 }
 0x205   :  { %v420_v22 = vmul.f32 %v1892_v16, %v403_v18 }
 0x206   :  { %v1427_v19 = vpop.f32.mrf.mxu1 }
 0x208   :  { %v406_v21 = vpop.f32.mrf.mxu1 }
 0x209   :  { %v421_v23 = vmul.f32 %v1894_v20, %v406_v21 }
 0x20a   :  { %v1428_v24 = vpop.f32.mrf.mxu1 }
 0x20b   :  { %v422_v25 = vpack.c.bf16 %v421_v23, %v420_v22 }
 0x20d   :  { %591 = vmatmul.mubr.bf16.vlgmr.msra.gmra.mxu1 %v422_v25 }
 0x20e   :  { %1449 = vmatprep.mubr.msk.bf16.mxu1 %vm1692_vm0, %v1691_v0 }
 0x2cd   :  { %v1311_v26 = vpop.f32.mrf.mxu1 }
 0x2cf   :  { %v1312_v27 = vpop.f32.mrf.mxu1 }
 0x2d0   :  { %v1313_v28 = vadd.f32 %v1312_v27, %v1311_v26  ;;  %v1536_v26 = vld [vmem:[#allocation8 + $0x48] sm:$0xff]  }
 0x2d1   :  { %v1314_v32 = vpop.f32.mrf.mxu1  ;;  %v1537_v27 = vld [vmem:[#allocation8 + $0x8] sm:$0xff]  }
 0x2d2   :  { %v593_v36 = vadd.f32 %v1313_v28, %v1217_v30  ;;  %v1538_v28 = vld [vmem:[#allocation8 + $0x40] sm:$0xff]  }
 0x2d3   :  { %v1315_v34 = vpop.f32.mrf.mxu1 }
 0x2d4   :  { %v1316_v38 = vadd.f32 %v1315_v34, %v1314_v32  ;;  %v599_v41 = vmax.f32 %v593_v36, 0.0 }
 0x2d6   :  { %v596_v39 = vadd.f32 %v1316_v38, %v1217_v30  ;;  %v1539_v30 = vld [vmem:[#allocation8] sm:$0xff]  }
 0x2d8   :  { %v600_v42 = vmax.f32 %v596_v39, 0.0 }
 0x2da   :  { %v601_v43 = vpack.c.bf16 %v600_v42, %v599_v41 }
 0x2dc   :  { %1430 = vmatpush3.bf16.msra.mxu0 %v601_v43 }
 0x2dd   :  { %1325 = vmatprep.subr.bf16.mxu0 %v1524_v44 }
 0x2df   :  { %1432 = vmatmul.mubr.msk.bf16.vlgmr.msra.gmra.mxu0 %vm284_vm1, %v1854_v17 }
 0x2e0   :  { %1435 = vmatprep.mubr.msk.bf16.mxu0 %vm1692_vm0, %v1691_v0  ;;  %1326 = vmatpush3.bf16.msra.mxu0 %v1525_v45 }
 0x2e1   :  { %1327 = vmatprep.subr.bf16.mxu0 %v1526_v46  ;;  %v1238_v46 = vld [vmem:[%s1971_s9] ss:$0 sm:$0xff] }
 0x2e4   :  { %1328 = vmatpush3.bf16.msra.mxu0 %v1527_v47 }
 0x2e5   :  { %1329 = vmatprep.subr.bf16.mxu0 %v1528_v48 }
 0x2e7   :  { %1436 = vmatmul.mubr.msk.bf16.gmra.mxu0 %vm284_vm1, %v1811_v8 }
 0x2e8   :  { %1439 = vmatprep.mubr.msk.bf16.mxu0 %vm1692_vm0, %v1691_v0  ;;  %1330 = vmatpush3.bf16.msra.mxu0 %v1529_v49 }
 0x2e9   :  { %1331 = vmatprep.subr.bf16.mxu0 %v1530_v50 }
 0x2ec   :  { %1332 = vmatpush3.bf16.msra.mxu0 %v1531_v51 }
 0x2ed   :  { %1333 = vmatprep.subr.bf16.mxu0 %v1532_v52 }
 0x2ef   :  { %1440 = vmatmul.mubr.msk.bf16.gmra.mxu0 %vm284_vm1, %v1824_v11 }
 0x2f0   :  { %879 = vmatprep.mubr.bf16.mxu0 %v601_v43  ;;  %1334 = vmatpush3.bf16.msra.mxu0 %v1533_v53 }
 0x2f1   :  { %1335 = vmatprep.subr.bf16.mxu0 %v1534_v54 }
 0x2f4   :  { %1336 = vmatpush3.bf16.msra.mxu0 %v1535_v55  ;;  %v1540_v55 = vld [vmem:[#allocation10 + $0x78] sm:$0xff]  }
 0x2f5   :  { %1337 = vmatprep.subr.bf16.mxu0 %v1536_v26 }
 0x2f8   :  { %1338 = vmatpush3.bf16.msra.mxu0 %v1537_v27 }
 0x2f9   :  { %1339 = vmatprep.subr.bf16.mxu0 %v1538_v28 }
 0x2fc   :  { %1340 = vmatpush3.bf16.msra.mxu0 %v1539_v30 }
 0x2fd   :  { %1467 = vmatprep.subr.bf16.mxu0 %v1691_v0 }
 0x39f   :  { %v636_v56 = vpop.f32.mrf.mxu0 }
 0x3a0   :  { %v637_v19 = vadd.f32 %v636_v56, %v1866_v29  ;;  %v1541_v56 = vld [vmem:[#allocation10 + $0x38] sm:$0xff]  }
 0x3a1   :  { %v1433_v57 = vpop.f32.mrf.mxu0 }
 0x3a2   :  { %v659_v24 = vmax.f32 %v637_v19, 0.0  ;;  %v1542_v57 = vld [vmem:[#allocation10 + $0x70] sm:$0xff]  }
 0x3a3   :  { %v639_v58 = vpop.f32.mrf.mxu0 }
 0x3a4   :  { %v640_v14 = vadd.f32 %v639_v58, %v1868_v31  ;;  %v1543_v58 = vld [vmem:[#allocation10 + $0x30] sm:$0xff]  }
 0x3a5   :  { %v1434_v59 = vpop.f32.mrf.mxu0 }
 0x3a6   :  { %v660_v22 = vmax.f32 %v640_v14, 0.0  ;;  %v1545_v59 = vld [vmem:[#allocation10 + $0x28] sm:$0xff]  }
 0x3a7   :  { %v644_v60 = vpop.f32.mrf.mxu0 }
 0x3a8   :  { %v645_v12 = vadd.f32 %v644_v60, %v1870_v33  ;;  %v665_v25 = vpack.c.bf16 %v660_v22, %v659_v24  ;;  %v1546_v60 = vld [vmem:[#allocation10 + $0x60] sm:$0xff]  }
 0x3a9   :  { %v1437_v62 = vpop.f32.mrf.mxu0 }
 0x3aa   :  { %v661_v21 = vmax.f32 %v645_v12, 0.0  ;;  %v1548_v62 = vld [vmem:[#allocation10 + $0x58] sm:$0xff]  }
 0x3ab   :  { %v647_v63 = vpop.f32.mrf.mxu0 }
 0x3ac   :  { %v648_v6 = vadd.f32 %v647_v63, %v1872_v35  ;;  %v1549_v63 = vld [vmem:[#allocation10 + $0x18] sm:$0xff]  }
 0x3ad   :  { %v1438_v1 = vpop.f32.mrf.mxu0 }
 0x3ae   :  { %v662_v15 = vmax.f32 %v648_v6, 0.0  ;;  %v1551_v1 = vld [vmem:[#allocation10 + $0x10] sm:$0xff]  }
 0x3af   :  { %v652_v2 = vpop.f32.mrf.mxu0 }
 0x3b0   :  { %v653_v4 = vadd.f32 %v652_v2, %v1874_v37  ;;  %v666_v23 = vpack.c.bf16 %v662_v15, %v661_v21 }
 0x3b1   :  { %v1441_v3 = vpop.f32.mrf.mxu0 }
 0x3b2   :  { %v663_v13 = vmax.f32 %v653_v4, 0.0 }
 0x3b3   :  { %v655_v5 = vpop.f32.mrf.mxu0 }
 0x3b4   :  { %v656_v9 = vadd.f32 %v655_v5, %v1877_v40 }
 0x3b5   :  { %v1442_v10 = vpop.f32.mrf.mxu0 }
 0x3b6   :  { %v664_v7 = vmax.f32 %v656_v9, 0.0 }
 0x3b8   :  { %v667_v18 = vpack.c.bf16 %v664_v7, %v663_v13 }
 0x3ba   :  { %1444 = vmatpush3.bf16.msra.mxu1 %v667_v18 }
 0x3bb   :  { %1445 = vmatprep.subr.bf16.mxu1 %v1691_v0 }
 0x3be   :  { %1446 = vmatpush3.bf16.msra.mxu1 %v666_v23 }
 0x3bf   :  { %1447 = vmatprep.subr.bf16.mxu1 %v1691_v0 }
 0x3c2   :  { %1448 = vmatpush3.bf16.msra.mxu1 %v665_v25 }
 0x3c3   :  { %1453 = vmatprep.subr.bf16.mxu1 %v1691_v0 }
 0x3c5   :  { %1450 = vmatmul.mubr.msk.bf16.vlgmr.msra.gmra.mxu1 %vm365_vm2, %v1886_v61 }
 0x3c6   :  { %1455 = vmatprep.mubr.msk.bf16.mxu1 %vm1692_vm0, %v1691_v0 }
 0x485   :  { %v702_v32 = vpop.f32.mrf.mxu1 }
 0x486   :  { %v709_v38 = vmul.f32 %v702_v32, %v1892_v16 }
 0x487   :  { %v1451_v34 = vpop.f32.mrf.mxu1 }
 0x488   :  { %v1555_v34 = vld [vmem:[#allocation10] sm:$0xff]  }
 0x489   :  { %v705_v36 = vpop.f32.mrf.mxu1 }
 0x48a   :  { %v710_v39 = vmul.f32 %v705_v36, %v1894_v20 }
 0x48b   :  { %v1452_v41 = vpop.f32.mrf.mxu1 }
 0x48c   :  { %v711_v42 = vpack.c.bf16 %v710_v39, %v709_v38 }
 0x48e   :  { %880 = vmatmul.mubr.bf16.vlgmr.msra.gmra.mxu0 %v711_v42 }
 0x48f   :  { %1473 = vmatprep.mubr.msk.bf16.mxu0 %vm1692_vm0, %v1691_v0 }
 0x54e   :  { %v1341_v43 = vpop.f32.mrf.mxu0 }
 0x550   :  { %v1342_v44 = vpop.f32.mrf.mxu0 }
 0x551   :  { %v1343_v45 = vadd.f32 %v1342_v44, %v1341_v43 }
 0x552   :  { %v1344_v47 = vpop.f32.mrf.mxu0 }
 0x553   :  { %v882_v49 = vadd.f32 %v1343_v45, %v1238_v46 }
 0x554   :  { %v1345_v48 = vpop.f32.mrf.mxu0 }
 0x555   :  { %v1346_v50 = vadd.f32 %v1345_v48, %v1344_v47  ;;  %v888_v52 = vmax.f32 %v882_v49, 0.0 }
 0x557   :  { %v885_v51 = vadd.f32 %v1346_v50, %v1238_v46 }
 0x559   :  { %v889_v53 = vmax.f32 %v885_v51, 0.0 }
 0x55b   :  { %v890_v54 = vpack.c.bf16 %v889_v53, %v888_v52 }
 0x55d   :  { %1454 = vmatpush3.bf16.msra.mxu1 %v890_v54 }
 0x55e   :  { %1355 = vmatprep.subr.bf16.mxu1 %v1540_v55 }
 0x560   :  { %1456 = vmatmul.mubr.msk.bf16.vlgmr.msra.gmra.mxu1 %vm284_vm1, %v1854_v17  ;;  %v1544_v17 = vld [vmem:[#allocation10 + $0x68] sm:$0xff]  }
 0x561   :  { %1459 = vmatprep.mubr.msk.bf16.mxu1 %vm1692_vm0, %v1691_v0  ;;  %1356 = vmatpush3.bf16.msra.mxu1 %v1541_v56 }
 0x562   :  { %1357 = vmatprep.subr.bf16.mxu1 %v1542_v57 }
 0x565   :  { %1358 = vmatpush3.bf16.msra.mxu1 %v1543_v58 }
 0x566   :  { %1359 = vmatprep.subr.bf16.mxu1 %v1544_v17 }
 0x568   :  { %1460 = vmatmul.mubr.msk.bf16.gmra.mxu1 %vm284_vm1, %v1811_v8  ;;  %v1547_v8 = vld [vmem:[#allocation10 + $0x20] sm:$0xff]  }
 0x569   :  { %1463 = vmatprep.mubr.msk.bf16.mxu1 %vm1692_vm0, %v1691_v0  ;;  %1360 = vmatpush3.bf16.msra.mxu1 %v1545_v59 }
 0x56a   :  { %1361 = vmatprep.subr.bf16.mxu1 %v1546_v60 }
 0x56d   :  { %1362 = vmatpush3.bf16.msra.mxu1 %v1547_v8 }
 0x56e   :  { %1363 = vmatprep.subr.bf16.mxu1 %v1548_v62 }
 0x570   :  { %1464 = vmatmul.mubr.msk.bf16.gmra.mxu1 %vm284_vm1, %v1824_v11  ;;  %v1550_v11 = vld [vmem:[#allocation10 + $0x50] sm:$0xff]  }
 0x571   :  { %1168 = vmatprep.mubr.bf16.mxu1 %v890_v54  ;;  %1364 = vmatpush3.bf16.msra.mxu1 %v1549_v63 }
 0x572   :  { %1365 = vmatprep.subr.bf16.mxu1 %v1550_v11 }
 0x575   :  { %1366 = vmatpush3.bf16.msra.mxu1 %v1551_v1 }
 0x620   :  { %v925_v2 = vpop.f32.mrf.mxu1 }
 0x621   :  { %v926_v28 = vadd.f32 %v925_v2, %v1866_v29  ;;  %v1554_v29 = vld [vmem:[#allocation10 + $0x40] sm:$0xff]  }
 0x622   :  { %v1457_v3 = vpop.f32.mrf.mxu1 }
 0x624   :  { %v928_v4 = vpop.f32.mrf.mxu1 }
 0x625   :  { %v929_v25 = vadd.f32 %v928_v4, %v1868_v31  ;;  %v1552_v31 = vld [vmem:[#allocation10 + $0x48] sm:$0xff]  }
 0x626   :  { %v1458_v5 = vpop.f32.mrf.mxu1  ;;  %1367 = vmatprep.subr.bf16.mxu1 %v1552_v31 }
 0x628   :  { %v933_v6 = vpop.f32.mrf.mxu1 }
 0x629   :  { %v934_v22 = vadd.f32 %v933_v6, %v1870_v33  ;;  %v1553_v33 = vld [vmem:[#allocation10 + $0x8] sm:$0xff]  }
 0x62a   :  { %v1461_v9 = vpop.f32.mrf.mxu1  ;;  %1368 = vmatpush3.bf16.msra.mxu1 %v1553_v33 }
 0x62b   :  { %v950_v30 = vmax.f32 %v934_v22, 0.0  ;;  %1369 = vmatprep.subr.bf16.mxu1 %v1554_v29 }
 0x62c   :  { %v936_v10 = vpop.f32.mrf.mxu1 }
 0x62d   :  { %v937_v18 = vadd.f32 %v936_v10, %v1872_v35  ;;  %v948_v35 = vmax.f32 %v926_v28, 0.0 }
 0x62e   :  { %v1462_v12 = vpop.f32.mrf.mxu1  ;;  %1370 = vmatpush3.bf16.msra.mxu1 %v1555_v34 }
 0x62f   :  { %v951_v26 = vmax.f32 %v937_v18, 0.0 }
 0x630   :  { %v941_v13 = vpop.f32.mrf.mxu1 }
 0x631   :  { %v942_v14 = vadd.f32 %v941_v13, %v1874_v37  ;;  %v949_v37 = vmax.f32 %v929_v25, 0.0  ;;  %v955_v32 = vpack.c.bf16 %v951_v26, %v950_v30 }
 0x632   :  { %v1465_v7 = vpop.f32.mrf.mxu1 }
 0x633   :  { %v952_v23 = vmax.f32 %v942_v14, 0.0 }
 0x634   :  { %v944_v15 = vpop.f32.mrf.mxu1 }
 0x635   :  { %v945_v19 = vadd.f32 %v944_v15, %v1877_v40  ;;  %v954_v40 = vpack.c.bf16 %v949_v37, %v948_v35 }
 0x636   :  { %v1466_v21 = vpop.f32.mrf.mxu1 }
 0x637   :  { %v953_v24 = vmax.f32 %v945_v19, 0.0 }
 0x639   :  { %v956_v27 = vpack.c.bf16 %v953_v24, %v952_v23 }
 0x63b   :  { %1468 = vmatpush3.bf16.msra.mxu0 %v956_v27 }
 0x63c   :  { %1469 = vmatprep.subr.bf16.mxu0 %v1691_v0 }
 0x63f   :  { %1470 = vmatpush3.bf16.msra.mxu0 %v955_v32 }
 0x640   :  { %1471 = vmatprep.subr.bf16.mxu0 %v1691_v0 }
 0x643   :  { %1472 = vmatpush3.bf16.msra.mxu0 %v954_v40 }
 0x646   :  { %1474 = vmatmul.mubr.msk.bf16.vlgmr.msra.gmra.mxu0 %vm365_vm2, %v1886_v61  ;;  %v1259_v61 = vld [vmem:[%s1973_s11] ss:$0 sm:$0xff] }
 0x706   :  { %v991_v36 = vpop.f32.mrf.mxu0 }
 0x707   :  { %v998_v41 = vmul.f32 %v991_v36, %v1892_v16 }
 0x708   :  { %v1475_v38 = vpop.f32.mrf.mxu0 }
 0x70a   :  { %v994_v39 = vpop.f32.mrf.mxu0 }
 0x70b   :  { %v999_v0 = vmul.f32 %v994_v39, %v1894_v20 }
 0x70c   :  { %v1476_v42 = vpop.f32.mrf.mxu0 }
 0x70d   :  { %v1000_v43 = vpack.c.bf16 %v999_v0, %v998_v41 }
 0x70f   :  { %1169 = vmatmul.mubr.bf16.vlgmr.msra.gmra.mxu1 %v1000_v43 }
 0x7cf   :  { %v1371_v44 = vpop.f32.mrf.mxu1 }
 0x7d1   :  { %v1372_v45 = vpop.f32.mrf.mxu1 }
 0x7d2   :  { %v1373_v46 = vadd.f32 %v1372_v45, %v1371_v44 }
 0x7d3   :  { %v1374_v47 = vpop.f32.mrf.mxu1 }
 0x7d4   :  { %v1171_v48 = vadd.f32 %v1373_v46, %v1259_v61 }
 0x7d5   :  { %v1375_v49 = vpop.f32.mrf.mxu1 }
 0x7d6   :  { %1177 = vst [vmem:[#allocation11] sm:$0xff] %v1171_v48  ;;  %v1376_v50 = vadd.f32 %v1375_v49, %v1374_v47 }
 0x7d8   :  { %v1174_v16 = vadd.f32 %v1376_v50, %v1259_v61 }
 0x7da   :  { %1178 = vst [vmem:[#allocation11 + $0x8] sm:$0xff] %v1174_v16 }
 0x7db   :  { %1667 = shalt.err (!%p1664_p1)
}
 0x7dc   :  { %s1695_s11 = smov 128   ;;  %s1696_s6 = smov 8  }
 0x7dd   :  { %1190 = dma.vmem_to_hbm [thread:$0]  %s1185_s2, 256, %s1974_s12, [#allocation4], %s1695_s11, %s1695_s11, %s1696_s6  }
 0x7de   :  { %1682 = dma.done.wait [#allocation4], 256  }
 0x7df   :  { %1683 = vsyncadd [#allocation4], 4294967040 }
 0x7e0   :  { %1194 = vsyncpa [#allocation3], 1 }
 0x7e1   :  { %1195 = vsyncpa [#allocation6], 1 }
 0x7e2   :  { %1196 = vsyncpa [#allocation9], 1 }
 0x7e3   :  { %1197 = vsyncpa [#allocation4], 1 }

</bundles_post_ra>
